<compile_context>
chip_gen: v7x
topology: tpu7x:2x2x1
jax: 0.10.0
libtpu: 0.0.40
codegen_flags: <defaults>
</compile_context>

<pallas_src>
import functools

import jax
import jax.numpy as jnp
from jax.experimental import pallas as pl
from jax.experimental.pallas import tpu as pltpu

_DILATIONS = (3, 5, 7)          # atrous_block6 / atrous_block12 / atrous_block18
_MAXD = max(_DILATIONS)         # shared zero-pad halo
_OFFSETS = tuple((ky, kx) for ky in range(3) for kx in range(3)
                 if not (ky == 1 and kx == 1))          # 8 non-centre taps, row-major


# ---------------------------------------------------------------------------
# Pallas kernel: fused ASPP (shortcut + 1x1 + 3 atrous branches + concat + add)
# ---------------------------------------------------------------------------
def _aspp_kernel(xc_ref, x6_ref, x12_ref, x18_ref, wc_ref, wt_ref, b_ref, o_ref):
    # xc_ref : (TH, W, Cin)        centre patch (= input rows of this tile), bf16
    # x*_ref : (TH, W, 8*Cin)      im2col of the 8 non-centre taps, one per dilation, bf16
    # wc_ref : (Cin, D)            fused centre weight (shortcut + 1x1 + atrous centre taps)
    # wt_ref : (3, 8*Cin, D//4)    compact non-centre tap weights, one block per dilation
    # b_ref  : (1, D)              fused bias, f32
    # o_ref  : (TH, W, D)          output row tile
    TH, W, D = o_ref.shape
    d4 = D // 4
    cin = xc_ref.shape[-1]
    k_tap = x6_ref.shape[-1]                       # 8 * Cin

    # One K=Cin matmul covers the shortcut, the 1x1 branch and the (1,1) tap of every
    # atrous branch (all folded into wc in the wrapper).  Full-D output lanes.
    acc = jnp.dot(xc_ref[...].reshape(TH * W, cin), wc_ref[...],
                  preferred_element_type=jnp.float32)              # (TH*W, D) f32

    # One K=8*Cin matmul per dilation against its compact (8*Cin, D/4) weight.  The
    # (TH, W, K) -> (TH*W, K) reshapes are layout-free (W is a multiple of the sublane
    # tile), so no per-tap slice/relayout work remains in the kernel.
    parts = [jnp.zeros((TH * W, d4), jnp.float32)]   # 1x1-branch columns already in acc
    for i, x_ref in enumerate((x6_ref, x12_ref, x18_ref)):
        parts.append(jnp.dot(x_ref[...].reshape(TH * W, k_tap), wt_ref[i],
                             preferred_element_type=jnp.float32))  # (TH*W, D/4)

    out = acc + jnp.concatenate(parts, axis=-1) + b_ref[...]
    o_ref[...] = out.reshape(TH, W, D).astype(o_ref.dtype)


# ---------------------------------------------------------------------------
# Wrapper-side preprocessing (weights fold + per-dilation im2col)
# ---------------------------------------------------------------------------
def _fold_weights(params, depth):
    """Fold the five convs into (centre weight, compact tap weights, bias), all f32."""
    d4 = depth // 4
    wc = params["short_w"].astype(jnp.float32)                 # (Cin, D)  shortcut
    wc = wc.at[:, 0:d4].add(params["conv_w"])                   # 1x1 branch -> block 0
    taps = []
    for bi, name in enumerate(("a6_w", "a12_w", "a18_w"), start=1):
        w = params[name]                                        # (3, 3, Cin, d4) HWIO
        wc = wc.at[:, bi * d4:(bi + 1) * d4].add(w[1, 1])       # centre tap -> block bi
        taps.append(jnp.concatenate([w[ky, kx] for (ky, kx) in _OFFSETS], axis=0))
    wt = jnp.stack(taps, axis=0)                                # (3, 8*Cin, d4) compact
    bias = params["short_b"] + jnp.concatenate(
        [params["conv_b"], params["a6_b"], params["a12_b"], params["a18_b"]])
    return wc, wt, bias.reshape(1, depth).astype(jnp.float32)


def _build_im2col(xp, H, W):
    """Per-dilation im2col of the 8 non-centre taps: list of (N, H, W, 8*Cin)."""
    cols = []
    for d in _DILATIONS:
        parts = [xp[:, _MAXD + (ky - 1) * d:_MAXD + (ky - 1) * d + H,
                     _MAXD + (kx - 1) * d:_MAXD + (kx - 1) * d + W, :]
                 for (ky, kx) in _OFFSETS]
        cols.append(jnp.concatenate(parts, axis=-1))
    return cols


def _vmem_limit_bytes():
    # ~75% of physical VMEM: ~96 MiB on v5e/v6e (128 MiB), ~48 MiB on v7x (64 MiB).
    try:
        cap = int(pltpu.get_tpu_info().vmem_capacity_bytes)
    except Exception:
        cap = 64 * 1024 * 1024
    return min(max(cap * 3 // 4, 32 * 1024 * 1024), 100 * 1024 * 1024)


def _pick_tile_rows(N, H, W, cin, depth, out_bytes, vmem_limit):
    """Largest row-tile that fits the VMEM budget and keeps >=2 grid steps (v7x, 2 TCs)."""
    per_row = W * (25 * cin * 2 + depth * out_bytes) * 2        # dbl-buffered ins + out
    weights = (cin * depth + 24 * cin * (depth // 4) + depth) * 2 * 2
    budget = max(vmem_limit // 2 - weights, per_row)
    th = 1
    for cand in range(1, H + 1):
        if H % cand:
            continue
        if N == 1 and H // cand < 2:        # keep both v7x TensorCores busy
            continue
        if cand * per_row <= budget:
            th = cand
    return th


# ---------------------------------------------------------------------------
# Forward pass (NCHW in / NCHW out, matching the PyTorch module)
# ---------------------------------------------------------------------------
def aspp_forward(params, x_nchw, *, tile_rows=None,
                 compute_dtype=jnp.bfloat16, out_dtype=jnp.bfloat16):
    N, Cin, H, W = x_nchw.shape
    depth = params["short_b"].shape[0]
    d4 = depth // 4

    # Weights folded in f32, then cast to bf16 MXU operands.
    wc, wt, bias = _fold_weights(params, depth)
    wc = wc.astype(compute_dtype)
    wt = wt.astype(compute_dtype)

    # TODO(synk): layout transposes, the shared max-dilation pad and the im2col below stay
    #             as plain XLA ops; at small Cin this is what makes the in-kernel
    #             contraction lane-dense, at large Cin it should move back in-kernel.
    x = jnp.transpose(x_nchw, (0, 2, 3, 1)).astype(compute_dtype)          # NHWC
    xp = jnp.pad(x, ((0, 0), (_MAXD, _MAXD), (_MAXD, _MAXD), (0, 0)))
    x6, x12, x18 = _build_im2col(xp, H, W)                                 # (N,H,W,8*Cin)

    vmem_limit = _vmem_limit_bytes()
    out_bytes = jnp.dtype(out_dtype).itemsize
    TH = tile_rows if tile_rows is not None else _pick_tile_rows(
        N, H, W, Cin, depth, out_bytes, vmem_limit)
    assert H % TH == 0, (H, TH)

    def row_spec(ch):
        return pl.BlockSpec((pl.Squeezed(), TH, W, ch), lambda n, r: (n, r, 0, 0))

    out = pl.pallas_call(
        _aspp_kernel,
        grid_spec=pltpu.PrefetchScalarGridSpec(
            num_scalar_prefetch=0,
            grid=(N, H // TH),
            in_specs=[
                row_spec(Cin),                      # centre patch
                row_spec(8 * Cin),                  # dilation 3 im2col
                row_spec(8 * Cin),                  # dilation 5 im2col
                row_spec(8 * Cin),                  # dilation 7 im2col
                # Grid-invariant weights/bias: constant block index -> DMA'd only once.
                # (For realistic Cin on v7x, also pass pipeline_mode=pl.Buffered(1) here.)
                pl.BlockSpec((Cin, depth), lambda n, r: (0, 0)),
                pl.BlockSpec((3, 8 * Cin, d4), lambda n, r: (0, 0, 0)),
                pl.BlockSpec((1, depth), lambda n, r: (0, 0)),
            ],
            out_specs=pl.BlockSpec((pl.Squeezed(), TH, W, depth),
                                   lambda n, r: (n, r, 0, 0)),
        ),
        out_shape=jax.ShapeDtypeStruct((N, H, W, depth), out_dtype),
        compiler_params=pltpu.CompilerParams(
            dimension_semantics=("parallel", "parallel"),
            vmem_limit_bytes=vmem_limit),
    )(x, x6, x12, x18, wc, wt, bias)

    return jnp.transpose(out, (0, 3, 1, 2))                                # back to NCHW


# ---------------------------------------------------------------------------
# Deterministic synthetic parameters (mirrors ASPP.__init__ shapes, HWIO layout)
# ---------------------------------------------------------------------------
def init_aspp_params(key, in_channel, depth):
    assert depth % 4 == 0
    d4 = depth // 4
    ks = jax.random.split(key, 10)

    def w(k, shape):
        return 0.1 * jax.random.normal(k, shape, jnp.float32)

    return {
        "conv_w": w(ks[0], (in_channel, d4)),        "conv_b": w(ks[1], (d4,)),
        "a6_w":   w(ks[2], (3, 3, in_channel, d4)),  "a6_b":   w(ks[3], (d4,)),
        "a12_w":  w(ks[4], (3, 3, in_channel, d4)),  "a12_b":  w(ks[5], (d4,)),
        "a18_w":  w(ks[6], (3, 3, in_channel, d4)),  "a18_b":  w(ks[7], (d4,)),
        "short_w": w(ks[8], (in_channel, depth)),    "short_b": w(ks[9], (depth,)),
    }


# ---------------------------------------------------------------------------
# Pure-JAX reference (f32) for a correctness sanity check
# ---------------------------------------------------------------------------
def aspp_reference(params, x_nchw):
    x = jnp.transpose(x_nchw, (0, 2, 3, 1))
    dn = ("NHWC", "HWIO", "NHWC")

    def conv(x, w, b, dil, pad):
        y = jax.lax.conv_general_dilated(
            x, w, window_strides=(1, 1), padding=[(pad, pad), (pad, pad)],
            rhs_dilation=(dil, dil), dimension_numbers=dn)
        return y + b

    c1 = conv(x, params["conv_w"][None, None], params["conv_b"], 1, 0)
    a6 = conv(x, params["a6_w"], params["a6_b"], 3, 3)
    a12 = conv(x, params["a12_w"], params["a12_b"], 5, 5)
    a18 = conv(x, params["a18_w"], params["a18_b"], 7, 7)
    sc = conv(x, params["short_w"][None, None], params["short_b"], 1, 0)
    y = jnp.concatenate([c1, a6, a12, a18], axis=-1) + sc
    return jnp.transpose(y, (0, 3, 1, 2))


if __name__ == "__main__":
    key = jax.random.PRNGKey(0)
    k_x, k_p = jax.random.split(key)

    # ASPP(in_channel=8, depth=128): depth is a 128-multiple so the fused output store is
    # lane-dense; spatial 16x16, batch 2 keeps everything small.
    in_channel, depth = 8, 128
    N, H, W = 2, 16, 16

    x = jax.random.normal(k_x, (N, in_channel, H, W), jnp.float32)
    params = init_aspp_params(k_p, in_channel, depth)

    fwd = jax.jit(functools.partial(aspp_forward, tile_rows=8))   # grid = (2, 2)
    out = jax.block_until_ready(fwd(params, x))
    assert out.shape == (N, depth, H, W), out.shape

    ref = jax.block_until_ready(aspp_reference(params, x))
    max_err = float(jnp.max(jnp.abs(out.astype(jnp.float32) - ref)))
    # bf16 MXU operands + bf16 output store vs f32 reference
    assert max_err < 1.5e-1, f"max abs error vs reference: {max_err}"

    print("KERNEL_OK")
</pallas_src>

<mosaic_0001>
module attributes {stable_mosaic.version = 11 : i64} {
  func.func @_aspp_kernel(%arg0: i32, %arg1: i32, %arg2: memref<1x8x16x8xbf16, #tpu.memory_space<vmem>>, %arg3: memref<1x8x16x64xbf16, #tpu.memory_space<vmem>>, %arg4: memref<1x8x16x64xbf16, #tpu.memory_space<vmem>>, %arg5: memref<1x8x16x64xbf16, #tpu.memory_space<vmem>>, %arg6: memref<8x128xbf16, #tpu.memory_space<vmem>>, %arg7: memref<3x64x32xbf16, #tpu.memory_space<vmem>>, %arg8: memref<1x128xf32, #tpu.memory_space<vmem>>, %arg9: memref<1x8x16x128xbf16, #tpu.memory_space<vmem>>) attributes {dimension_semantics = [#tpu.dimension_semantics<parallel>, #tpu.dimension_semantics<parallel>], iteration_bounds = array<i64: 2, 2>, scalar_prefetch = 0 : i64, scratch_operands = 0 : i64, tpu.core_type = #tpu.core_type<tc>, window_params = [{transform_indices = @transform_0, window_bounds = array<i64: 1, 8, 16, 8>}, {transform_indices = @transform_1, window_bounds = array<i64: 1, 8, 16, 64>}, {transform_indices = @transform_2, window_bounds = array<i64: 1, 8, 16, 64>}, {transform_indices = @transform_3, window_bounds = array<i64: 1, 8, 16, 64>}, {pipeline_mode = #tpu.pipeline_mode<synchronous>, transform_indices = @transform_4, window_bounds = array<i64: 8, 128>}, {pipeline_mode = #tpu.pipeline_mode<synchronous>, transform_indices = @transform_5, window_bounds = array<i64: 3, 64, 32>}, {pipeline_mode = #tpu.pipeline_mode<synchronous>, transform_indices = @transform_6, window_bounds = array<i64: 1, 128>}, {transform_indices = @transform_7, window_bounds = array<i64: 1, 8, 16, 128>}]} {
    %c0 = arith.constant 0 : index
    %c0_0 = arith.constant 0 : index
    %c0_1 = arith.constant 0 : index
    %c0_2 = arith.constant 0 : index
    %0 = vector.load %arg2[%c0, %c0_0, %c0_1, %c0_2] : memref<1x8x16x8xbf16, #tpu.memory_space<vmem>>, vector<1x8x16x8xbf16>
    %1 = vector.shape_cast %0 : vector<1x8x16x8xbf16> to vector<8x16x8xbf16>
    %2 = vector.shape_cast %1 : vector<8x16x8xbf16> to vector<128x8xbf16>
    %c0_3 = arith.constant 0 : index
    %c0_4 = arith.constant 0 : index
    %3 = vector.load %arg6[%c0_3, %c0_4] : memref<8x128xbf16, #tpu.memory_space<vmem>>, vector<8x128xbf16>
    %cst = arith.constant dense<0.000000e+00> : vector<128x128xf32>
    %4 = tpu.matmul %2, %3, %cst {dimension_numbers = #tpu.dot_dimension_numbers<[1], [0], [0], [1], [0, 0, 1, 1], [], []>} : vector<128x8xbf16>, vector<8x128xbf16>, vector<128x128xf32> -> vector<128x128xf32>
    %cst_5 = arith.constant 0.000000e+00 : f32
    %5 = vector.broadcast %cst_5 : f32 to vector<128x32xf32>
    %c0_6 = arith.constant 0 : index
    %c0_7 = arith.constant 0 : index
    %c0_8 = arith.constant 0 : index
    %c0_9 = arith.constant 0 : index
    %6 = vector.load %arg3[%c0_6, %c0_7, %c0_8, %c0_9] : memref<1x8x16x64xbf16, #tpu.memory_space<vmem>>, vector<1x8x16x64xbf16>
    %7 = vector.shape_cast %6 : vector<1x8x16x64xbf16> to vector<8x16x64xbf16>
    %8 = vector.shape_cast %7 : vector<8x16x64xbf16> to vector<128x64xbf16>
    %c0_10 = arith.constant 0 : index
    %c0_11 = arith.constant 0 : index
    %c0_12 = arith.constant 0 : index
    %9 = vector.load %arg7[%c0_10, %c0_11, %c0_12] : memref<3x64x32xbf16, #tpu.memory_space<vmem>>, vector<1x64x32xbf16>
    %10 = vector.shape_cast %9 : vector<1x64x32xbf16> to vector<64x32xbf16>
    %cst_13 = arith.constant dense<0.000000e+00> : vector<128x32xf32>
    %11 = tpu.matmul %8, %10, %cst_13 {dimension_numbers = #tpu.dot_dimension_numbers<[1], [0], [0], [1], [0, 0, 1, 1], [], []>} : vector<128x64xbf16>, vector<64x32xbf16>, vector<128x32xf32> -> vector<128x32xf32>
    %c0_14 = arith.constant 0 : index
    %c0_15 = arith.constant 0 : index
    %c0_16 = arith.constant 0 : index
    %c0_17 = arith.constant 0 : index
    %12 = vector.load %arg4[%c0_14, %c0_15, %c0_16, %c0_17] : memref<1x8x16x64xbf16, #tpu.memory_space<vmem>>, vector<1x8x16x64xbf16>
    %13 = vector.shape_cast %12 : vector<1x8x16x64xbf16> to vector<8x16x64xbf16>
    %14 = vector.shape_cast %13 : vector<8x16x64xbf16> to vector<128x64xbf16>
    %c1 = arith.constant 1 : index
    %c0_18 = arith.constant 0 : index
    %c0_19 = arith.constant 0 : index
    %15 = vector.load %arg7[%c1, %c0_18, %c0_19] : memref<3x64x32xbf16, #tpu.memory_space<vmem>>, vector<1x64x32xbf16>
    %16 = vector.shape_cast %15 : vector<1x64x32xbf16> to vector<64x32xbf16>
    %cst_20 = arith.constant dense<0.000000e+00> : vector<128x32xf32>
    %17 = tpu.matmul %14, %16, %cst_20 {dimension_numbers = #tpu.dot_dimension_numbers<[1], [0], [0], [1], [0, 0, 1, 1], [], []>} : vector<128x64xbf16>, vector<64x32xbf16>, vector<128x32xf32> -> vector<128x32xf32>
    %c0_21 = arith.constant 0 : index
    %c0_22 = arith.constant 0 : index
    %c0_23 = arith.constant 0 : index
    %c0_24 = arith.constant 0 : index
    %18 = vector.load %arg5[%c0_21, %c0_22, %c0_23, %c0_24] : memref<1x8x16x64xbf16, #tpu.memory_space<vmem>>, vector<1x8x16x64xbf16>
    %19 = vector.shape_cast %18 : vector<1x8x16x64xbf16> to vector<8x16x64xbf16>
    %20 = vector.shape_cast %19 : vector<8x16x64xbf16> to vector<128x64xbf16>
    %c2 = arith.constant 2 : index
    %c0_25 = arith.constant 0 : index
    %c0_26 = arith.constant 0 : index
    %21 = vector.load %arg7[%c2, %c0_25, %c0_26] : memref<3x64x32xbf16, #tpu.memory_space<vmem>>, vector<1x64x32xbf16>
    %22 = vector.shape_cast %21 : vector<1x64x32xbf16> to vector<64x32xbf16>
    %cst_27 = arith.constant dense<0.000000e+00> : vector<128x32xf32>
    %23 = tpu.matmul %20, %22, %cst_27 {dimension_numbers = #tpu.dot_dimension_numbers<[1], [0], [0], [1], [0, 0, 1, 1], [], []>} : vector<128x64xbf16>, vector<64x32xbf16>, vector<128x32xf32> -> vector<128x32xf32>
    %24 = tpu.concatenate %5, %11, %17, %23 in 1 : vector<128x32xf32>, vector<128x32xf32>, vector<128x32xf32>, vector<128x32xf32> -> vector<128x128xf32>
    %25 = arith.addf %4, %24 : vector<128x128xf32>
    %c0_28 = arith.constant 0 : index
    %c0_29 = arith.constant 0 : index
    %26 = vector.load %arg8[%c0_28, %c0_29] : memref<1x128xf32, #tpu.memory_space<vmem>>, vector<1x128xf32>
    %27 = vector.broadcast %26 : vector<1x128xf32> to vector<128x128xf32>
    %28 = arith.addf %25, %27 : vector<128x128xf32>
    %29 = vector.shape_cast %28 : vector<128x128xf32> to vector<8x16x128xf32>
    %30 = arith.truncf %29 : vector<8x16x128xf32> to vector<8x16x128xbf16>
    %c0_30 = arith.constant 0 : index
    %c0_31 = arith.constant 0 : index
    %c0_32 = arith.constant 0 : index
    %c0_33 = arith.constant 0 : index
    %31 = vector.load %arg9[%c0_30, %c0_31, %c0_32, %c0_33] : memref<1x8x16x128xbf16, #tpu.memory_space<vmem>>, vector<1x8x16x128xbf16>
    %32 = vector.shape_cast %31 : vector<1x8x16x128xbf16> to vector<8x16x128xbf16>
    %33 = vector.shape_cast %30 : vector<8x16x128xbf16> to vector<1x8x16x128xbf16>
    tpu.vector_store %arg9[%c0_30, %c0_31, %c0_32, %c0_33], %33 {strides = array<i32>} : memref<1x8x16x128xbf16, #tpu.memory_space<vmem>>, vector<1x8x16x128xbf16>,
    return
  }
  func.func @transform_0(%arg0: i32, %arg1: i32) -> (i32, i32, i32, i32) {
    %c0_i32 = arith.constant 0 : i32
    %c0_i32_0 = arith.constant 0 : i32
    %c0_i32_1 = arith.constant 0 : i32
    return %arg0, %arg1, %c0_i32, %c0_i32_0 : i32, i32, i32, i32
  }
  func.func @transform_1(%arg0: i32, %arg1: i32) -> (i32, i32, i32, i32) {
    %c0_i32 = arith.constant 0 : i32
    %c0_i32_0 = arith.constant 0 : i32
    %c0_i32_1 = arith.constant 0 : i32
    return %arg0, %arg1, %c0_i32, %c0_i32_0 : i32, i32, i32, i32
  }
  func.func @transform_2(%arg0: i32, %arg1: i32) -> (i32, i32, i32, i32) {
    %c0_i32 = arith.constant 0 : i32
    %c0_i32_0 = arith.constant 0 : i32
    %c0_i32_1 = arith.constant 0 : i32
    return %arg0, %arg1, %c0_i32, %c0_i32_0 : i32, i32, i32, i32
  }
  func.func @transform_3(%arg0: i32, %arg1: i32) -> (i32, i32, i32, i32) {
    %c0_i32 = arith.constant 0 : i32
    %c0_i32_0 = arith.constant 0 : i32
    %c0_i32_1 = arith.constant 0 : i32
    return %arg0, %arg1, %c0_i32, %c0_i32_0 : i32, i32, i32, i32
  }
  func.func @transform_4(%arg0: i32, %arg1: i32) -> (i32, i32) {
    %c0_i32 = arith.constant 0 : i32
    %c0_i32_0 = arith.constant 0 : i32
    %c0_i32_1 = arith.constant 0 : i32
    return %c0_i32, %c0_i32_0 : i32, i32
  }
  func.func @transform_5(%arg0: i32, %arg1: i32) -> (i32, i32, i32) {
    %c0_i32 = arith.constant 0 : i32
    %c0_i32_0 = arith.constant 0 : i32
    %c0_i32_1 = arith.constant 0 : i32
    %c0_i32_2 = arith.constant 0 : i32
    return %c0_i32, %c0_i32_0, %c0_i32_1 : i32, i32, i32
  }
  func.func @transform_6(%arg0: i32, %arg1: i32) -> (i32, i32) {
    %c0_i32 = arith.constant 0 : i32
    %c0_i32_0 = arith.constant 0 : i32
    %c0_i32_1 = arith.constant 0 : i32
    return %c0_i32, %c0_i32_0 : i32, i32
  }
  func.func @transform_7(%arg0: i32, %arg1: i32) -> (i32, i32, i32, i32) {
    %c0_i32 = arith.constant 0 : i32
    %c0_i32_0 = arith.constant 0 : i32
    %c0_i32_1 = arith.constant 0 : i32
    return %arg0, %arg1, %c0_i32, %c0_i32_0 : i32, i32, i32, i32
  }
}

</mosaic_0001>

<bundles_post_ra>
// kernel: aspp_forward.1
= control target key start
LH: loop header
LB: loop body
LE: loop exit
PB: predicated region body
PF: predicated region fallthrough
CT: control target
= control target key end

     0   :  { %12 = vsyncpa [#allocation3], 0  ;;  %s2838_s0 = inlined_call_operand.vmem [shape: bf16[2,16,16,8], index: 0, kind: input, shape index: {}]   ;;  %s2839_s1 = inlined_call_operand.vmem [shape: bf16[2,16,16,64], index: 1, kind: input, shape index: {}]   ;;  %s2840_s2 = inlined_call_operand.vmem [shape: bf16[2,16,16,64], index: 2, kind: input, shape index: {}]   ;;  %s2841_s3 = inlined_call_operand.vmem [shape: bf16[2,16,16,64], index: 3, kind: input, shape index: {}]   ;;  %s2842_s4 = inlined_call_operand.vmem [shape: bf16[8,128], index: 4, kind: input, shape index: {}]   ;;  %s2843_s5 = inlined_call_operand.vmem [shape: bf16[3,64,32], index: 5, kind: input, shape index: {}]   ;;  %s2844_s6 = inlined_call_operand.vmem [shape: f32[1,128], index: 6, kind: input, shape index: {}]   ;;  %s2845_s7 = inlined_call_operand.hbm [shape: bf16[2,16,16,128], index: 7, kind: output, shape index: {}]  }
   0x1   :  { %14 = vsyncpa [#allocation3 + $0x1], 0  ;;  %s2350_s24 = smov 0   ;;  %s2352_s25 = smov 0  }
   0x2   :  { %s2354_s26 = smov 0   ;;  %s2356_s27 = smov 0  }
   0x3   :  { %s2358_s28 = smov 0   ;;  %s2360_s29 = smov 0  }
   0x4   :  { %s2362_s30 = smov 0   ;;  %s2364_s8 = smov 0  }
   0x5 LB: > { %s1752_s9 = sadd.s32 4294967295, %s2303_s8   ;;  %s1753_s10 = sadd.s32 4294967294, %s2303_s8   ;;  %s2303_s8 = sphi %s2364_s8, %s20_s8   ;;  %s2299_s30 = sphi %s2362_s30, %s2860_s30   ;;  %s2295_s29 = sphi %s2360_s29, %s2859_s29   ;;  %s2291_s28 = sphi %s2358_s28, %s2858_s28   ;;  %s2287_s27 = sphi %s2356_s27, %s2857_s27   ;;  %s2283_s26 = sphi %s2354_s26, %s2856_s26   ;;  %s2279_s25 = sphi %s2352_s25, %s2855_s25   ;;  %s2275_s24 = sphi %s2350_s24, %s2854_s24  }
   0x6   : > { %s29_s11 = sadd.s32 1, %s2295_s29  ;;  %s32_s12 = sadd.s32 1, %s2299_s30 }
   0x7   : > { %p30_p0 = scmp.ge.s32.totalorder %s29_s11, 2  ;;  %p226_p1 = scmp.ne.s32.totalorder %s2283_s26, %s2279_s25 }
   0x8   : > { %p227_p2 = scmp.eq.s32.totalorder %s1752_s9, 3  ;;  %p232_p5 = scmp.ne.s32.totalorder %s2279_s25, %s2275_s24 }
   0x9   : > { %s2862_s11 = smov (%p30_p0, %s29_s11), 0  ;;  %s2864_s12 = smov (!%p30_p0, %s32_s12), %s2299_s30 }
   0xa   : > { %2848 = sst [smem:[#allocation5_spill]] %s2862_s11  ;;  %s212_s13 = ssub.s32 %s2295_s29, %s2862_s11 }
   0xb   : > { %p2401_p3 = por %p227_p2, %p226_p1  ;;  %p34_p4 = scmp.ge.s32.totalorder %s2864_s12, 2 }
   0xc   : > { %p233_p6 = scmp.eq.s32.totalorder %s1753_s10, 3  ;;  %p1756_p7 = scmp.ge.s32.totalorder %s2303_s8, 1 }
   0xd   : > { %s2866_s12 = smov (%p34_p4, %s2864_s12), 0  ;;  %p316_p9 = scmp.lt.s32.totalorder %s2303_s8, 5 }
   0xe   : > { %2850 = sst [smem:[#allocation6_spill]] %s2866_s12  ;;  %p2410_p8 = por %p233_p6, %p232_p5 }
   0xf   : > { %s211_s16 = ssub.s32 %s2299_s30, %s2866_s12  ;;  %s216_s17 = sadd.s32 1, %s2283_s26 }
  0x10   : > { %s213_s18 = sor.u32 %s212_s13, %s211_s16  ;;  %p317_p10 = pnand %p1756_p7, %p316_p9 }
  0x11   : > { %p214_p11 = scmp.eq.s32.totalorder %s213_s18, 0  ;;  %v2165_v0 = vld [vmem:[%s2843_s5] sm:$0xff] (!%p317_p10)   ;;  %s1758_s22 = sshll.u32 (!%p317_p10), %s2287_s27, 3  ;;  %v2167_v2 = vld [vmem:[%s2843_s5 + $0x8] sm:$0xff] (!%p317_p10)   ;;  %v2169_v4 = vld [vmem:[%s2843_s5 + $0x10] sm:$0xff] (!%p317_p10)   ;;  %vm534_vm0 = vcmask (!%p317_p10), 523264  }
  0x12   : > { %320 = sbr.rel (%p317_p10) target bundleno = 477 (0x1dd), region = 48  ;;  %v2166_v1 = vld [vmem:[%s2843_s5 + $0x20] sm:$0xff] (!%p317_p10)   ;;  %p384_p12 = scmp.lt.s32.totalorder (!%p317_p10), %s2291_s28, 1  ;;  %1999 = vmatprep.subr.bf16.mxu0 (!%p317_p10), %v2165_v0  ;;  %v2168_v3 = vld [vmem:[%s2843_s5 + $0x28] sm:$0xff] (!%p317_p10)   ;;  %v2170_v5 = vld [vmem:[%s2843_s5 + $0x30] sm:$0xff] (!%p317_p10)   ;;  %vm1383_vm1 = vcmask (!%p317_p10), 1043456  }
  0x13   : > { %s2419_s19 = scalar_select %p214_p11, %s2283_s26, %s216_s17  }
  0x14   : > { %p386_p13 = scmp.lt.s32.totalorder (!%p317_p10), %s1758_s22, 15  ;;  %2023 = vmatprep.subr.bf16.mxu1 (!%p317_p10), %v2166_v1  ;;  %2000 = vmatpush3.bf16.msra.mxu0 (!%p317_p10), %v2165_v0  ;;  %v2171_v6 = vld [vmem:[%s2843_s5 + $0x18] sm:$0xff] (!%p317_p10)   ;;  %v2183_v10 = vld [vmem:[%s2843_s5 + $0x40] sm:$0xff] (!%p317_p10)   ;;  %v2186_v15 = vld [vmem:[%s2843_s5 + $0x48] sm:$0xff] (!%p317_p10)   ;;  %vm1358_vm2 = vcmask (!%p317_p10), 64512   ;;  %vm1268_vm3 = vcmask (!%p317_p10), 261120  }
  0x15   : > { %2024 = vmatpush3.bf16.msra.mxu1 (!%p317_p10), %v2166_v1  ;;  %2001 = vmatprep.subr.bf16.mxu0 (!%p317_p10), %v2167_v2  ;;  %v2172_v7 = vld [vmem:[%s2843_s5 + $0x38] sm:$0xff] (!%p317_p10)   ;;  %v2189_v20 = vld [vmem:[%s2843_s5 + $0x50] sm:$0xff] (!%p317_p10)   ;;  %v445_v26 = vld [vmem:[%s2842_s4] sm:$0xf] (!%p317_p10)  ;;  %vm1301_vm4 = vcmask (!%p317_p10), 785408   ;;  %s380_s9 = sand.u32 (!%p317_p10), 1, %s2279_s25  }
  0x16   : > { %2025 = vmatprep.subr.bf16.mxu1 (!%p317_p10), %v2168_v3  ;;  %v2192_v21 = vld [vmem:[%s2843_s5 + $0x58] sm:$0xff] (!%p317_p10)   ;;  %v1385_v28 = vsel (!%p317_p10), %vm1383_vm1, %v445_v26, 0  ;;  %s1906_s20 = sshll.u32 (!%p317_p10), %s2287_s27, 4 }
  0x18   : > { %2002 = vmatpush3.bf16.msra.mxu0 (!%p317_p10), %v2167_v2 }
  0x19   : > { %s385_s18 = scalar_select %p384_p12, %s2291_s28, 1  ;;  %2026 = vmatpush3.bf16.msra.mxu1 %v2168_v3  ;;  %2003 = vmatprep.subr.bf16.mxu0 %v2169_v4 }
  0x1a   : > { %s2868_s22 = smov (!%p386_p13, %s1758_s22), 15  ;;  %2027 = vmatprep.subr.bf16.mxu1 %v2170_v5 }
  0x1b   : > { %s1760_s10 = sshll.u32 %s385_s18, 5  ;;  %s1759_s13 = sshll.u32 %s2868_s22, 1 }
  0x1c   : > { %s390_s12 = sadd.s32 %s1760_s10, %s1759_s13  ;;  %2004 = vmatpush3.bf16.msra.mxu0 %v2169_v4  ;;  %s2784_s10 = scalar_lea.sflag [#allocation3], %s380_s9 }
  0x1d   : > { %s2445_s11 = sshll.u32 %s390_s12, 2  ;;  %2028 = vmatpush3.bf16.msra.mxu1 %v2170_v5  ;;  %2005 = vmatprep.subr.bf16.mxu0 %v2171_v6 }
  0x1e   : > { %s2454_s22 = scalar_lea.vmem %s2839_s1, %s2445_s11  ;;  %s2460_s12 = scalar_lea.vmem %s2840_s2, %s2445_s11  ;;  %2029 = vmatprep.subr.bf16.mxu1 %v2172_v7 }
  0x1f   : > { %v2173_v8 = vld [vmem:[%s2454_s22] sm:$0xff]   ;;  %v2175_v11 = vld [vmem:[%s2454_s22 + $0x8] sm:$0xff]   ;;  %v2177_v13 = vld [vmem:[%s2454_s22 + $0x10] sm:$0xff]   ;;  %s2497_s16 = scalar_lea.vmem %s2841_s3, %s2445_s11  ;;  %s2511_s21 = scalar_lea.vmem %s2838_s0, %s2445_s11 }
  0x20   : > { %v2174_v9 = vld [vmem:[%s2460_s12] sm:$0xff]   ;;  %2007 = vmatprep.mubr.msk.bf16.mxu0 %vm534_vm0, %v2173_v8  ;;  %v2176_v12 = vld [vmem:[%s2460_s12 + $0x8] sm:$0xff]   ;;  %2006 = vmatpush3.bf16.msra.mxu0 %v2171_v6  ;;  %v2179_v14 = vld [vmem:[%s2460_s12 + $0x10] sm:$0xff]   ;;  %s2305_s11 = smov 32  }
  0x21   : > { %2031 = vmatprep.mubr.msk.bf16.mxu1 %vm534_vm0, %v2174_v9  ;;  %2030 = vmatpush3.bf16.msra.mxu1 %v2172_v7  ;;  %v2178_v16 = vld [vmem:[%s2454_s22 + $0x18] sm:$0xff]   ;;  %v2181_v18 = vld [vmem:[%s2454_s22 + $0x20] sm:$0xff]   ;;  %v2182_v22 = vld [vmem:[%s2454_s22 + $0x28] sm:$0xff]  }
  0x22   : > { %2047 = vmatprep.subr.bf16.mxu0 %v2183_v10  ;;  %v2180_v17 = vld [vmem:[%s2460_s12 + $0x18] sm:$0xff]   ;;  %v2184_v19 = vld [vmem:[%s2460_s12 + $0x20] sm:$0xff]   ;;  %v2185_v23 = vld [vmem:[%s2460_s12 + $0x28] sm:$0xff]   ;;  %2089 = vmatprep.subr.msk.bf16.mxu1 %vm1383_vm1, %v445_v26 }
  0x23   : > { %2008 = vmatmul.mubr.msk.bf16.vlgmr.msra.gmra.mrb[0].mxu0 %vm534_vm0, %v2175_v11  ;;  %v2187_v24 = vld [vmem:[%s2454_s22 + $0x30] sm:$0xff]   ;;  %v2188_v27 = vld [vmem:[%s2454_s22 + $0x38] sm:$0xff]   ;;  %v2193_v30 = vld [vmem:[%s2497_s16] sm:$0xff]   ;;  %s2306_s22 = smov 64  }
  0x24   : > { %2032 = vmatmul.mubr.msk.bf16.vlgmr.msra.gmra.mrb[0].mxu1 %vm534_vm0, %v2176_v12  ;;  %2011 = vmatprep.mubr.msk.bf16.mxu0 %vm534_vm0, %v2177_v13  ;;  %v2190_v25 = vld [vmem:[%s2460_s12 + $0x30] sm:$0xff]   ;;  %v2191_v29 = vld [vmem:[%s2460_s12 + $0x38] sm:$0xff]   ;;  %v2201_v31 = vld [vmem:[%s2511_s21] sm:$0xff]   ;;  %s2307_s12 = smov 96  }
  0x25   : > { %2035 = vmatprep.mubr.msk.bf16.mxu1 %vm534_vm0, %v2179_v14  ;;  %2048 = vmatpush3.bf16.msra.mxu0 %v2183_v10  ;;  %v2194_v32 = vld [vmem:[%s2497_s16 + $0x8] sm:$0xff]   ;;  %v2195_v33 = vld [vmem:[%s2497_s16 + $0x10] sm:$0xff]   ;;  %v2196_v36 = vld [vmem:[%s2497_s16 + $0x18] sm:$0xff]  }
  0x26   : > { %2049 = vmatprep.subr.bf16.mxu0 %v2186_v15  ;;  %2072 = vmatpush3.bf16.msra.mxu1 %v1385_v28  ;;  %v2202_v34 = vld [vmem:[%s2511_s21 + $0x8] sm:$0xff]   ;;  %v2203_v35 = vld [vmem:[%s2511_s21 + $0x10] sm:$0xff]   ;;  %v2197_v37 = vld [vmem:[%s2497_s16 + $0x20] sm:$0xff]  }
  0x27   : > { %v2204_v38 = vld [vmem:[%s2511_s21 + $0x18] sm:$0xff]   ;;  %v2205_v39 = vld [vmem:[%s2511_s21 + $0x20] sm:$0xff]   ;;  %v2198_v40 = vld [vmem:[%s2497_s16 + $0x28] sm:$0xff]  }
  0x28   : > { %v2199_v41 = vld [vmem:[%s2497_s16 + $0x30] sm:$0xff]   ;;  %v2206_v42 = vld [vmem:[%s2511_s21 + $0x28] sm:$0xff]   ;;  %v2200_v44 = vld [vmem:[%s2497_s16 + $0x38] sm:$0xff]   ;;  %s1757_s16 = sshll.u32 %s380_s9, 6 }
  0x29   : > { %2050 = vmatpush3.bf16.msra.mxu0 %v2186_v15  ;;  %v2207_v43 = vld [vmem:[%s2511_s21 + $0x30] sm:$0xff]   ;;  %v2208_v45 = vld [vmem:[%s2511_s21 + $0x38] sm:$0xff]   ;;  %s2686_s17 = scalar_lea.vmem [#allocation2], %s1757_s16  ;;  %s1886_s21 = sshll.u32 %s2291_s28, 5 }
  0x2a   : > { %2051 = vmatprep.subr.bf16.mxu0 %v2189_v20  ;;  %s1601_s27 = sadd.s32 %s1906_s20, %s1886_s21  ;;  %s1604_s23 = sshll.u32 %s2686_s17, 4  ;;  %s2779_s23 = int_to_ptr.vmem [resolvable:$true] %s1604_s23 }
  0x2b   : > { %2012 = vmatmul.mubr.msk.bf16.gmra.mrb[4].mxu0 %vm534_vm0, %v2178_v16  ;;  %s1887_s28 = sshll.u32 %s1601_s27, 6  ;;  %s2209_s13 = scalar_lea.vmem %s2779_s23, 1024 }
  0x2c   : > { %2036 = vmatmul.mubr.msk.bf16.gmra.mrb[4].mxu1 %vm534_vm0, %v2180_v17  ;;  %2015 = vmatprep.mubr.msk.bf16.mxu0 %vm534_vm0, %v2181_v18  ;;  %p2210_p0 = scmp.ne.s32.totalorder %s2779_s23, %s2209_s13  ;;  %s2308_s16 = smov [#allocation2]  }
  0x2d   : > { %2039 = vmatprep.mubr.msk.bf16.mxu1 %vm534_vm0, %v2184_v19  ;;  %2052 = vmatpush3.bf16.msra.mxu0 %v2189_v20  ;;  %s2213_s20 = sshll.u32 %s2308_s16, 4  ;;  %s2214_s20 = int_to_ptr.vmem [resolvable:$false] %s2213_s20 }
  0x2e   : > { %2053 = vmatprep.subr.bf16.mxu0 %v2192_v21  ;;  %p2211_p1 = pnand %p2210_p0, %p2401_p3  ;;  %s2215_s21 = scalar_lea.vmem %s2214_s20, 2048 }
  0x2f   : > { %p2216_p4 = scmp.lt.s32.totalorder %s2779_s23, %s2214_s20  ;;  %p2217_p5 = scmp.lt.s32.totalorder %s2215_s21, %s2209_s13 }
  0x30   : > { %p2212_p2 = pneg %p2211_p1 }
  0x31   : > { %2054 = vmatpush3.bf16.msra.mxu0 %v2192_v21  ;;  %p2218_p6 = por %p2217_p5, %p2216_p4 }
  0x33   : > { %2016 = vmatmul.mubr.msk.bf16.gmra.mrb[8].mxu0 %vm534_vm0, %v2182_v22  ;;  %p2219_p7 = pnand %p2218_p6, %p2212_p2 }
  0x34   : > { %2040 = vmatmul.mubr.msk.bf16.gmra.mrb[8].mxu1 %vm534_vm0, %v2185_v23  ;;  %2019 = vmatprep.mubr.msk.bf16.mxu0 %vm534_vm0, %v2187_v24 }
  0x35   : > { %2043 = vmatprep.mubr.msk.bf16.mxu1 %vm534_vm0, %v2190_v25 }
  0x3b   : > { %2020 = vmatmul.mubr.msk.bf16.gmra.mrb[12].mxu0 %vm534_vm0, %v2188_v27 }
  0x3c   : > { %2044 = vmatmul.mubr.msk.bf16.gmra.mrb[12].mxu1 %vm534_vm0, %v2191_v29  ;;  %2055 = vmatprep.mubr.msk.bf16.mxu0 %vm534_vm0, %v2193_v30 }
  0x3d   : > { %2073 = vmatprep.mubr.msk.bf16.mxu1 %vm1358_vm2, %v2201_v31 }
  0x43   : > { %2056 = vmatmul.mubr.msk.bf16.vlgmr.msra.gmra.mrb[16].mxu0 %vm534_vm0, %v2194_v32 }
  0x44   : > { %2059 = vmatprep.mubr.msk.bf16.mxu0 %vm534_vm0, %v2195_v33  ;;  %2074 = vmatmul.mubr.msk.bf16.vlgmr.msra.gmra.mrb[16].mxu1 %vm1358_vm2, %v2202_v34 }
  0x45   : > { %2077 = vmatprep.mubr.msk.bf16.mxu1 %vm1358_vm2, %v2203_v35 }
  0x4b   : > { %2060 = vmatmul.mubr.msk.bf16.gmra.mrb[20].mxu0 %vm534_vm0, %v2196_v36 }
  0x4c   : > { %2063 = vmatprep.mubr.msk.bf16.mxu0 %vm534_vm0, %v2197_v37  ;;  %2078 = vmatmul.mubr.msk.bf16.gmra.mrb[20].mxu1 %vm1358_vm2, %v2204_v38 }
  0x4d   : > { %2081 = vmatprep.mubr.msk.bf16.mxu1 %vm1358_vm2, %v2205_v39 }
  0x53   : > { %2064 = vmatmul.mubr.msk.bf16.gmra.mrb[24].mxu0 %vm534_vm0, %v2198_v40 }
  0x54   : > { %2067 = vmatprep.mubr.msk.bf16.mxu0 %vm534_vm0, %v2199_v41  ;;  %2082 = vmatmul.mubr.msk.bf16.gmra.mrb[24].mxu1 %vm1358_vm2, %v2206_v42 }
  0x55   : > { %2085 = vmatprep.mubr.msk.bf16.mxu1 %vm1358_vm2, %v2207_v43 }
  0x5b   : > { %2068 = vmatmul.mubr.msk.bf16.gmra.mrb[28].mxu0 %vm534_vm0, %v2200_v44 }
  0x5c   : > { %2086 = vmatmul.mubr.msk.bf16.gmra.mrb[28].mxu1 %vm1358_vm2, %v2208_v45 }
  0xf6   : > { %v2009_v46 = vpop.f32.mrb[0].mxu0 }
  0xf7   : > { %v2033_v47 = vpop.f32.mrb[0].mxu1  ;;  %1096 = vrot.lane.b32.xlu1 %v2009_v46, %s2305_s11  ;;  %v593_v48 = vpop.f32.mrb[1].mxu0 }
  0xf8   : > { %1160 = vrot.lane.b32.xlu0 %v2033_v47, %s2306_s22  ;;  %v803_v49 = vpop.f32.mrb[1].mxu1  ;;  %v2010_v50 = vpop.f32.mrb[2].mxu0 }
  0xf9   : > { %v2034_v51 = vpop.f32.mrb[2].mxu1  ;;  %v596_v52 = vpop.f32.mrb[3].mxu0 }
  0xfa   : > { %v806_v53 = vpop.f32.mrb[3].mxu1 }
  0xfb   : > { %1098 = vrot.lane.b32.xlu1 %v2010_v50, %s2305_s11 }
  0xfc   : > { %1092 = vrot.lane.b32.xlu0 %v593_v48, %s2305_s11 }
  0xfe   : > { %v2013_v54 = vpop.f32.mrb[4].mxu0 }
  0xff   : > { %1162 = vrot.lane.b32.xlu1 %v2034_v51, %s2306_s22  ;;  %v609_v55 = vpop.f32.mrb[5].mxu0  ;;  %v2037_v56 = vpop.f32.mrb[4].mxu1 }
 0x100   : > { %1156 = vrot.lane.b32.xlu0 %v803_v49, %s2306_s22  ;;  %v2014_v57 = vpop.f32.mrb[6].mxu0  ;;  %v819_v58 = vpop.f32.mrb[5].mxu1 }
 0x101   : > { %v612_v59 = vpop.f32.mrb[7].mxu0  ;;  %v2038_v60 = vpop.f32.mrb[6].mxu1 }
 0x102   : > { %v822_v61 = vpop.f32.mrb[7].mxu1 }
 0x103   : > { %1158 = vrot.lane.b32.xlu1 %v806_v53, %s2306_s22 }
 0x104   : > { %1094 = vrot.lane.b32.xlu0 %v596_v52, %s2305_s11 }
 0x106   : > { %v2017_v62 = vpop.f32.mrb[8].mxu0 }
 0x107   : > { %1106 = vrot.lane.b32.xlu1 %v2014_v57, %s2305_s11  ;;  %v625_v63 = vpop.f32.mrb[9].mxu0  ;;  %v2041_v0 = vpop.f32.mrb[8].mxu1 }
 0x108   : > { %1104 = vrot.lane.b32.xlu0 %v2013_v54, %s2305_s11  ;;  %v2018_v1 = vpop.f32.mrb[10].mxu0  ;;  %v835_v2 = vpop.f32.mrb[9].mxu1 }
 0x109   : > { %v628_v3 = vpop.f32.mrb[11].mxu0  ;;  %v2042_v4 = vpop.f32.mrb[10].mxu1 }
 0x10a   : > { %v838_v5 = vpop.f32.mrb[11].mxu1 }
 0x10b   : > { %1170 = vrot.lane.b32.xlu1 %v2038_v60, %s2306_s22 }
 0x10c   : > { %1168 = vrot.lane.b32.xlu0 %v2037_v56, %s2306_s22 }
 0x10e   : > { %v2021_v6 = vpop.f32.mrb[12].mxu0 }
 0x10f   : > { %1102 = vrot.lane.b32.xlu1 %v612_v59, %s2305_s11  ;;  %v641_v7 = vpop.f32.mrb[13].mxu0  ;;  %v2045_v8 = vpop.f32.mrb[12].mxu1 }
 0x110   : > { %1100 = vrot.lane.b32.xlu0 %v609_v55, %s2305_s11  ;;  %v2022_v9 = vpop.f32.mrb[14].mxu0  ;;  %v851_v10 = vpop.f32.mrb[13].mxu1 }
 0x111   : > { %v644_v11 = vpop.f32.mrb[15].mxu0  ;;  %v2046_v12 = vpop.f32.mrb[14].mxu1 }
 0x112   : > { %v854_v13 = vpop.f32.mrb[15].mxu1 }
 0x113   : > { %1166 = vrot.lane.b32.xlu1 %v822_v61, %s2306_s22 }
 0x114   : > { %1164 = vrot.lane.b32.xlu0 %v819_v58, %s2306_s22 }
 0x116   : > { %v2057_v14 = vpop.f32.mrb[16].mxu0 }
 0x117   : > { %1114 = vrot.lane.b32.xlu1 %v2018_v1, %s2305_s11  ;;  %v1013_v15 = vpop.f32.mrb[17].mxu0  ;;  %v2578_v24 = vpop.f32.mrb[16].mxu1 }
 0x118   : > { %1112 = vrot.lane.b32.xlu0 %v2017_v62, %s2305_s11  ;;  %v2058_v16 = vpop.f32.mrb[18].mxu0  ;;  %v2581_v27 = vpop.f32.mrb[17].mxu1 }
 0x119   : > { %v1016_v17 = vpop.f32.mrb[19].mxu0  ;;  %v2584_v28 = vpop.f32.mrb[18].mxu1 }
 0x11a   : > { %v2587_v29 = vpop.f32.mrb[19].mxu1 }
 0x11b   : > { %1178 = vrot.lane.b32.xlu1 %v2042_v4, %s2306_s22 }
 0x11c   : > { %1176 = vrot.lane.b32.xlu0 %v2041_v0, %s2306_s22 }
 0x11e   : > { %v2061_v18 = vpop.f32.mrb[20].mxu0 }
 0x11f   : > { %1110 = vrot.lane.b32.xlu1 %v628_v3, %s2305_s11  ;;  %v1029_v19 = vpop.f32.mrb[21].mxu0  ;;  %v2591_v34 = vpop.f32.mrb[20].mxu1 }
 0x120   : > { %1108 = vrot.lane.b32.xlu0 %v625_v63, %s2305_s11  ;;  %v2062_v20 = vpop.f32.mrb[22].mxu0  ;;  %v2593_v35 = vpop.f32.mrb[21].mxu1 }
 0x121   : > { %v1032_v21 = vpop.f32.mrb[23].mxu0  ;;  %v2596_v36 = vpop.f32.mrb[22].mxu1 }
 0x122   : > { %v2599_v37 = vpop.f32.mrb[23].mxu1 }
 0x123   : > { %1174 = vrot.lane.b32.xlu1 %v838_v5, %s2306_s22 }
 0x124   : > { %1172 = vrot.lane.b32.xlu0 %v835_v2, %s2306_s22 }
 0x126   : > { %v2065_v22 = vpop.f32.mrb[24].mxu0 }
 0x127   : > { %1122 = vrot.lane.b32.xlu1 %v2022_v9, %s2305_s11  ;;  %v1045_v23 = vpop.f32.mrb[25].mxu0  ;;  %v2601_v38 = vpop.f32.mrb[24].mxu1 }
 0x128   : > { %1120 = vrot.lane.b32.xlu0 %v2021_v6, %s2305_s11  ;;  %v2066_v25 = vpop.f32.mrb[26].mxu0  ;;  %v2603_v39 = vpop.f32.mrb[25].mxu1 }
 0x129   : > { %v1048_v26 = vpop.f32.mrb[27].mxu0  ;;  %v2605_v40 = vpop.f32.mrb[26].mxu1 }
 0x12a   : > { %v2607_v41 = vpop.f32.mrb[27].mxu1 }
 0x12b   : > { %1186 = vrot.lane.b32.xlu1 %v2046_v12, %s2306_s22 }
 0x12c   : > { %1184 = vrot.lane.b32.xlu0 %v2045_v8, %s2306_s22 }
 0x12e   : > { %v2069_v30 = vpop.f32.mrb[28].mxu0 }
 0x12f   : > { %1118 = vrot.lane.b32.xlu1 %v644_v11, %s2305_s11  ;;  %v1061_v31 = vpop.f32.mrb[29].mxu0  ;;  %v2609_v42 = vpop.f32.mrb[28].mxu1 }
 0x130   : > { %1116 = vrot.lane.b32.xlu0 %v641_v7, %s2305_s11  ;;  %v2070_v32 = vpop.f32.mrb[30].mxu0  ;;  %v2611_v43 = vpop.f32.mrb[29].mxu1 }
 0x131   : > { %v1064_v33 = vpop.f32.mrb[31].mxu0  ;;  %v2613_v44 = vpop.f32.mrb[30].mxu1 }
 0x132   : > { %v2615_v45 = vpop.f32.mrb[31].mxu1 }
 0x133   : > { %1182 = vrot.lane.b32.xlu1 %v854_v13, %s2306_s22 }
 0x134   : > { %1180 = vrot.lane.b32.xlu0 %v851_v10, %s2306_s22 }
 0x137   : > { %1226 = vrot.lane.b32.xlu1 %v2058_v16, %s2307_s12 }
 0x138   : > { %1224 = vrot.lane.b32.xlu0 %v2057_v14, %s2307_s12 }
 0x13b   : > { %1222 = vrot.lane.b32.xlu1 %v1016_v17, %s2307_s12 }
 0x13c   : > { %1220 = vrot.lane.b32.xlu0 %v1013_v15, %s2307_s12 }
 0x13f   : > { %1234 = vrot.lane.b32.xlu1 %v2062_v20, %s2307_s12  ;;  %v2664_v20 = vld [vmem:[%s2844_s6] ss:$0 sm:$0xff] }
 0x140   : > { %1232 = vrot.lane.b32.xlu0 %v2061_v18, %s2307_s12 }
 0x143   : > { %1230 = vrot.lane.b32.xlu1 %v1032_v21, %s2307_s12 }
 0x144   : > { %1228 = vrot.lane.b32.xlu0 %v1029_v19, %s2307_s12 }
 0x147   : > { %1242 = vrot.lane.b32.xlu1 %v2066_v25, %s2307_s12 }
 0x148   : > { %1240 = vrot.lane.b32.xlu0 %v2065_v22, %s2307_s12 }
 0x14b   : > { %1238 = vrot.lane.b32.xlu1 %v1048_v26, %s2307_s12 }
 0x14c   : > { %1236 = vrot.lane.b32.xlu0 %v1045_v23, %s2307_s12 }
 0x14f   : > { %1246 = vrot.lane.b32.xlu1 %v1064_v33, %s2307_s12 }
 0x150   : > { %1244 = vrot.lane.b32.xlu0 %v1061_v31, %s2307_s12 }
 0x153   : > { %1250 = vrot.lane.b32.xlu1 %v2070_v32, %s2307_s12 }
 0x154   : > { %1248 = vrot.lane.b32.xlu0 %v2069_v30, %s2307_s12  ;;  %s2777_s12 = scalar_lea.hbm %s2845_s7, %s1887_s28 }
 0x169   : > { %v1097_v46 = vpop.permute.xlu1 %1096 }
 0x16a   : > { %v1161_v47 = vpop.permute.xlu0 %1160  ;;  %v1271_v14 = vsel %vm1268_vm3, 0.0, %v1097_v46 }
 0x16b   : > { %v1287_v18 = vsel %vm534_vm0, %v1271_v14, %v1161_v47 }
 0x16d   : > { %v1099_v48 = vpop.permute.xlu1 %1098 }
 0x16e   : > { %v1093_v49 = vpop.permute.xlu0 %1092  ;;  %v1272_v15 = vsel %vm1268_vm3, 0.0, %v1099_v48 }
 0x16f   : > { %v1269_v30 = vsel %vm1268_vm3, 0.0, %v1093_v49 }
 0x171   : > { %v1163_v50 = vpop.permute.xlu1 %1162 }
 0x172   : > { %v1157_v51 = vpop.permute.xlu0 %1156  ;;  %v1288_v16 = vsel %vm534_vm0, %v1272_v15, %v1163_v50 }
 0x173   : > { %v1285_v46 = vsel %vm534_vm0, %v1269_v30, %v1157_v51 }
 0x175   : > { %v1159_v52 = vpop.permute.xlu1 %1158 }
 0x176   : > { %v1095_v53 = vpop.permute.xlu0 %1094 }
 0x177   : > { %v1270_v19 = vsel %vm1268_vm3, 0.0, %v1095_v53 }
 0x178   : > { %v1286_v31 = vsel %vm534_vm0, %v1270_v19, %v1159_v52 }
 0x179   : > { %v1107_v54 = vpop.permute.xlu1 %1106 }
 0x17a   : > { %v1105_v55 = vpop.permute.xlu0 %1104  ;;  %v1276_v53 = vsel %vm1268_vm3, 0.0, %v1107_v54 }
 0x17b   : > { %v1275_v52 = vsel %vm1268_vm3, 0.0, %v1105_v55 }
 0x17d   : > { %v1171_v56 = vpop.permute.xlu1 %1170 }
 0x17e   : > { %v1169_v57 = vpop.permute.xlu0 %1168  ;;  %v1292_v15 = vsel %vm534_vm0, %v1276_v53, %v1171_v56 }
 0x181   : > { %v1103_v58 = vpop.permute.xlu1 %1102 }
 0x182   : > { %v2617_v59 = vpop.permute.xlu0 %1100  ;;  %v1274_v56 = vsel %vm1268_vm3, 0.0, %v1103_v58 }
 0x185   : > { %v2619_v60 = vpop.permute.xlu1 %1166 }
 0x186   : > { %v2621_v61 = vpop.permute.xlu0 %1164 }
 0x189   : > { %v2623_v62 = vpop.permute.xlu1 %1114 }
 0x18a   : > { %v2625_v63 = vpop.permute.xlu0 %1112 }
 0x18d   : > { %v2627_v0 = vpop.permute.xlu1 %1178 }
 0x18e   : > { %v2629_v1 = vpop.permute.xlu0 %1176 }
 0x191   : > { %v2631_v2 = vpop.permute.xlu1 %1110 }
 0x192   : > { %v2633_v3 = vpop.permute.xlu0 %1108 }
 0x193   : > { %v1277_v53 = vsel %vm1268_vm3, 0.0, %v2633_v3 }
 0x195   : > { %v2635_v4 = vpop.permute.xlu1 %1174 }
 0x196   : > { %v2637_v5 = vpop.permute.xlu0 %1172 }
 0x199   : > { %v2639_v6 = vpop.permute.xlu1 %1122 }
 0x19a   : > { %v2641_v7 = vpop.permute.xlu0 %1120 }
 0x19d   : > { %v2643_v8 = vpop.permute.xlu1 %1186 }
 0x19e   : > { %v2645_v9 = vpop.permute.xlu0 %1184 }
 0x1a1   : > { %v2647_v10 = vpop.permute.xlu1 %1118 }
 0x1a2   : > { %v2649_v11 = vpop.permute.xlu0 %1116 }
 0x1a5   : > { %v2651_v12 = vpop.permute.xlu1 %1182 }
 0x1a6   : > { %v2653_v13 = vpop.permute.xlu0 %1180 }
 0x1a9   : > { %v1227_v17 = vpop.permute.xlu1 %1226 }
 0x1aa   : > { %v1225_v21 = vpop.permute.xlu0 %1224  ;;  %v1305_v22 = vsel %vm1301_vm4, %v1288_v16, %v1227_v17  ;;  %v1291_v17 = vsel %vm534_vm0, %v1275_v52, %v1169_v57  ;;  %v1273_v57 = vsel %vm1268_vm3, 0.0, %v2617_v59  ;;  %v1293_v52 = vsel %vm534_vm0, %v1277_v53, %v2637_v5 }
 0x1ab   : > { %v1304_v23 = vsel %vm1301_vm4, %v1287_v18, %v1225_v21  ;;  %v1433_v25 = vadd.f32 %v2584_v28, %v1305_v22  ;;  %v1290_v22 = vsel %vm534_vm0, %v1274_v56, %v2619_v60  ;;  %v1280_v60 = vsel %vm1268_vm3, 0.0, %v2623_v62 }
 0x1ac   : > { %v1430_v26 = vadd.f32 %v2578_v24, %v1304_v23  ;;  %v1281_v5 = vsel %vm1268_vm3, 0.0, %v2649_v11 }
 0x1ad   : > { %v1494_v32 = vadd.f32 %v2664_v20, %v1433_v25  ;;  %v1223_v33 = vpop.permute.xlu1 %1222 }
 0x1ae   : > { %v1493_v47 = vadd.f32 %v2664_v20, %v1430_v26  ;;  %v1221_v48 = vpop.permute.xlu0 %1220  ;;  %v1303_v50 = vsel %vm1301_vm4, %v1286_v31, %v1223_v33  ;;  %v1289_v26 = vsel %vm534_vm0, %v1273_v57, %v2621_v61  ;;  %v1279_v33 = vsel %vm1268_vm3, 0.0, %v2625_v63 }
 0x1af   : > { %v1302_v28 = vsel %vm1301_vm4, %v1285_v46, %v1221_v48  ;;  %v1425_v24 = vadd.f32 %v2587_v29, %v1303_v50  ;;  %v1296_v61 = vsel %vm534_vm0, %v1280_v60, %v2627_v0  ;;  %v1295_v48 = vsel %vm534_vm0, %v1279_v33, %v2629_v1 }
 0x1b0   : > { %v1915_v14 = vpack.c.bf16 %v1494_v32, %v1493_v47  ;;  %v1422_v49 = vadd.f32 %v2581_v27, %v1302_v28  ;;  %v1278_v0 = vsel %vm1268_vm3, 0.0, %v2631_v2 }
 0x1b1   : > { %v1492_v51 = vadd.f32 %v2664_v20, %v1425_v24  ;;  %v1235_v16 = vpop.permute.xlu1 %1234  ;;  %v1294_v1 = vsel %vm534_vm0, %v1278_v0, %v2635_v4  ;;  %v1282_v4 = vsel %vm1268_vm3, 0.0, %v2647_v10 }
 0x1b2   : > { %1947 = vst [vmem:[%s2686_s17 + $0x8] sm:$0xff] %v1915_v14   ;;  %v1491_v29 = vadd.f32 %v2664_v20, %v1422_v49  ;;  %v1233_v54 = vpop.permute.xlu0 %1232  ;;  %v1309_v18 = vsel %vm1301_vm4, %v1292_v15, %v1235_v16 }
 0x1b3   : > { %v1308_v27 = vsel %vm1301_vm4, %v1291_v17, %v1233_v54  ;;  %v1449_v55 = vadd.f32 %v2596_v36, %v1309_v18  ;;  %v1298_v17 = vsel %vm534_vm0, %v1282_v4, %v2651_v12  ;;  %v1297_v18 = vsel %vm534_vm0, %v1281_v5, %v2653_v13 }
 0x1b4   : > { %v1910_v19 = vpack.c.bf16 %v1492_v51, %v1491_v29  ;;  %v1446_v21 = vadd.f32 %v2591_v34, %v1308_v27  ;;  %v1284_v12 = vsel %vm1268_vm3, 0.0, %v2639_v6  ;;  %v1283_v13 = vsel %vm1268_vm3, 0.0, %v2641_v7 }
 0x1b5   : > { %v1498_v23 = vadd.f32 %v2664_v20, %v1449_v55  ;;  %v1231_v25 = vpop.permute.xlu1 %1230 }
 0x1b6   : > { %1911 = vst [vmem:[%s2686_s17] sm:$0xff] %v1910_v19   ;;  %v1497_v36 = vadd.f32 %v2664_v20, %v1446_v21  ;;  %v1229_v58 = vpop.permute.xlu0 %1228  ;;  %v1307_v30 = vsel %vm1301_vm4, %v1290_v22, %v1231_v25  ;;  %v1300_v19 = vsel %vm534_vm0, %v1284_v12, %v2643_v8 }
 0x1b7   : > { %v1306_v34 = vsel %vm1301_vm4, %v1289_v26, %v1229_v58  ;;  %v1441_v59 = vadd.f32 %v2599_v37, %v1307_v30 }
 0x1b8   : > { %v1925_v31 = vpack.c.bf16 %v1498_v23, %v1497_v36  ;;  %v1438_v32 = vadd.f32 %v2593_v35, %v1306_v34 }
 0x1b9   : > { %v1496_v46 = vadd.f32 %v2664_v20, %v1441_v59  ;;  %v1243_v47 = vpop.permute.xlu1 %1242 }
 0x1ba   : > { %1949 = vst [vmem:[%s2686_s17 + $0x18] sm:$0xff] %v1925_v31   ;;  %v1495_v37 = vadd.f32 %v2664_v20, %v1438_v32  ;;  %v1241_v62 = vpop.permute.xlu0 %1240  ;;  %v1313_v50 = vsel %vm1301_vm4, %v1296_v61, %v1243_v47 }
 0x1bb   : > { %v1312_v35 = vsel %vm1301_vm4, %v1295_v48, %v1241_v62  ;;  %v1465_v63 = vadd.f32 %v2605_v40, %v1313_v50 }
 0x1bc   : > { %v1920_v28 = vpack.c.bf16 %v1496_v46, %v1495_v37  ;;  %v1462_v24 = vadd.f32 %v2601_v38, %v1312_v35 }
 0x1bd   : > { %v1502_v14 = vadd.f32 %v2664_v20, %v1465_v63  ;;  %v1239_v49 = vpop.permute.xlu1 %1238 }
 0x1be   : > { %1948 = vst [vmem:[%s2686_s17 + $0x10] sm:$0xff] %v1920_v28   ;;  %v1501_v40 = vadd.f32 %v2664_v20, %v1462_v24  ;;  %v1237_v2 = vpop.permute.xlu0 %1236  ;;  %v1311_v38 = vsel %vm1301_vm4, %v1294_v1, %v1239_v49 }
 0x1bf   : > { %v1310_v3 = vsel %vm1301_vm4, %v1293_v52, %v1237_v2  ;;  %v1457_v15 = vadd.f32 %v2607_v41, %v1311_v38 }
 0x1c0   : > { %v1935_v51 = vpack.c.bf16 %v1502_v14, %v1501_v40  ;;  %v1454_v16 = vadd.f32 %v2603_v39, %v1310_v3 }
 0x1c1   : > { %v1500_v29 = vadd.f32 %v2664_v20, %v1457_v15  ;;  %v1247_v54 = vpop.permute.xlu1 %1246 }
 0x1c2   : > { %1951 = vst [vmem:[%s2686_s17 + $0x28] sm:$0xff] %v1935_v51   ;;  %v1499_v41 = vadd.f32 %v2664_v20, %v1454_v16  ;;  %v1245_v10 = vpop.permute.xlu0 %1244  ;;  %v1315_v27 = vsel %vm1301_vm4, %v1298_v17, %v1247_v54 }
 0x1c3   : > { %v1314_v39 = vsel %vm1301_vm4, %v1297_v18, %v1245_v10  ;;  %v1473_v11 = vadd.f32 %v2615_v45, %v1315_v27  ;;  %v1299_v45 = vsel %vm534_vm0, %v1283_v13, %v2645_v9 }
 0x1c4   : > { %v1930_v55 = vpack.c.bf16 %v1500_v29, %v1499_v41  ;;  %v1470_v56 = vadd.f32 %v2611_v43, %v1314_v39 }
 0x1c5   : > { %v1504_v21 = vadd.f32 %v2664_v20, %v1473_v11  ;;  %v1251_v57 = vpop.permute.xlu1 %1250 }
 0x1c6   : > { %1950 = vst [vmem:[%s2686_s17 + $0x20] sm:$0xff] %v1930_v55   ;;  %v1503_v6 = vadd.f32 %v2664_v20, %v1470_v56  ;;  %v1249_v43 = vpop.permute.xlu0 %1248  ;;  %v1317_v7 = vsel %vm1301_vm4, %v1300_v19, %v1251_v57 }
 0x1c7   : > { %v1316_v22 = vsel %vm1301_vm4, %v1299_v45, %v1249_v43  ;;  %v1481_v8 = vadd.f32 %v2613_v44, %v1317_v7 }
 0x1c8   : > { %v1940_v23 = vpack.c.bf16 %v1504_v21, %v1503_v6  ;;  %v1478_v25 = vadd.f32 %v2609_v42, %v1316_v22 }
 0x1c9   : > { %v1506_v26 = vadd.f32 %v2664_v20, %v1481_v8 }
 0x1ca   : > { %1952 = vst [vmem:[%s2686_s17 + $0x30] sm:$0xff] %v1940_v23   ;;  %v1505_v9 = vadd.f32 %v2664_v20, %v1478_v25 }
 0x1cc   : > { %v1945_v36 = vpack.c.bf16 %v1506_v26, %v1505_v9 }
 0x1ce   : > { %1953 = vst [vmem:[%s2686_s17 + $0x38] sm:$0xff] %v1945_v36  }
 0x1cf   : > { %2222 = shalt.err (!%p2219_p7)
}
 0x1d0   : > { %s2223_s9 = scalar_lea.hbm %s2777_s12, 1024  ;;  %s2227_s28 = scalar_lea.hbm %s2845_s7, 4096 }
 0x1d1   : > { %p2224_p9 = scmp.ne.s32.totalorder %s2777_s12, %s2223_s9  ;;  %p2228_p12 = scmp.lt.u32.totalorder %s2777_s12, %s2845_s7 }
 0x1d2   : > { %p2229_p13 = scmp.lt.u32.totalorder %s2227_s28, %s2223_s9  ;;  %p2231_p1 = scmp.lt.u32.totalorder %s2223_s9, %s2777_s12 }
 0x1d3   : > { %p2225_p10 = pnand %p2224_p9, %p2401_p3 }
 0x1d4   : > { %p2230_p0 = por %p2229_p13, %p2228_p12 }
 0x1d5   : > { %p2226_p11 = pneg %p2225_p10 }
 0x1d6   : > { %p2232_p2 = por %p2231_p1, %p2230_p0 }
 0x1d8   : > { %p2233_p4 = pnand %p2232_p2, %p2226_p11 }
 0x1da   : > { %2236 = shalt.err (!%p2233_p4)
}
 0x1db   : > { %s2309_s13 = smov 4  }
 0x1dc   : > { %2090 = dma.vmem_to_hbm [thread:$0]  (%p2401_p3), %s2779_s23, 1024, %s2777_s12, %s2784_s10, %s2306_s22, %s2306_s22, %s2309_s13  }
 0x1dd PF: > { %p2096_p5 = scmp.ge.s32.totalorder %s2303_s8, 2  ;;  %s1619_s16 = sand.u32 1, %s2275_s24  }
 0x1de   : > { %s1620_s20 = scalar_lea.sflag [#allocation3], %s1619_s16 }
 0x1df   : > { %p2093_p6 = pnand %p2096_p5, %p2410_p8 }
 0x1e1   : > { %2270 = dma.done.wait (!%p2093_p6), %s1620_s20, 1024  }
 0x1e2   : > { %2272 = vsyncadd (!%p2093_p6), %s1620_s20, 4294966272  ;;  %s20_s8 = sadd.s32 1, %s2303_s8   ;;  %s2852_s14 = sld [smem:[#allocation5_spill]] }
 0x1e3   : > { %p17_p7 = scmp.ge.s32.totalorder %s20_s8, 6   ;;  %s2853_s22 = sld [smem:[#allocation6_spill]] }
 0x1e4   : > { %s2854_s24 = smov %s2279_s25  ;;  %s2855_s25 = smov %s2283_s26 }
 0x1e5   : > { %s2856_s26 = smov %s2419_s19  ;;  %s2857_s27 = smov %s2295_s29 }
 0x1e6   : > { %s2858_s28 = smov %s2299_s30  ;;  %19 = sbr.rel (!%p17_p7) target bundleno = 5 (0x5), region = 94 }
 0x1e8   : > { %s2859_s29 = smov %s2852_s14 }
 0x1e9   : > { %s2860_s30 = smov %s2853_s22 }
 0x1ed   :  { %1625 = vsyncpa [#allocation3], 1 }
 0x1ee   :  { %1627 = vsyncpa [#allocation3 + $0x1], 1 }

</bundles_post_ra>
